<compile_context>
chip_gen: v6e
topology: v6e:2x2x1
jax: 0.10.0
libtpu: 0.0.40
codegen_flags: <defaults>
</compile_context>

<pallas_src>
import functools

import jax
import jax.numpy as jnp
from jax import lax
from jax.experimental import pallas as pl
from jax.experimental.pallas import tpu as pltpu


def _warp_kernel(image_ref, flow_ref, out_ref, *, S, C):
    """One (batch, pixel-tile) grid step.

    image_ref: (1, C*S, S)   whole image of this batch; rows = (c, y), cols = x
    flow_ref : (1, 2, TP)    flow (x, y) per output pixel of this tile
    out_ref  : (1, C, TP)    warped output pixels of this tile
    """
    f32 = jnp.float32
    bf16 = jnp.bfloat16
    TP = out_ref.shape[-1]
    S_f = float(S)

    # ---- in-kernel base grid (removes the (2, P) input stream) -------------
    # Flat output pixel p = i*S + j ; i drives grid_x, j drives grid_y.
    t = pl.program_id(1)
    p = (t * TP + lax.broadcasted_iota(jnp.int32, (1, TP), 1)).astype(f32)
    # Exact floor(p / S) in f32: approximate quotient then +-1 correction.
    # All values involved are < 2^23, so the products / compares are exact.
    i = jnp.floor(p * (1.0 / S))
    i = i + ((i + 1.0) * S_f <= p).astype(f32) - (i * S_f > p).astype(f32)
    j = p - i * S_f
    base_x = i * (2.0 / (S - 1)) - 1.0                       # (1, TP)
    base_y = j * (2.0 / (S - 1)) - 1.0

    fx = flow_ref[0, 0:1, :].astype(f32)                     # (1, TP)
    fy = flow_ref[0, 1:2, :].astype(f32)

    # torch: grid = (base_grid + flow) * 2 - 1
    x_norm = 2.0 * (base_x + fx) - 1.0
    y_norm = 2.0 * (base_y + fy) - 1.0

    # grid_sample unnormalization (align_corners=False); border padding = clamp
    src_x = jnp.clip(((x_norm + 1.0) * S_f - 1.0) * 0.5, 0.0, S_f - 1.0)
    src_y = jnp.clip(((y_norm + 1.0) * S_f - 1.0) * 0.5, 0.0, S_f - 1.0)

    # Separable bilinear "hat" weights (sub/abs/max only).  Clamped source
    # coords make the border row absorb the full weight, identical to torch
    # 'border' padding (coincident corner weights sum to 1).
    rows = lax.broadcasted_iota(jnp.int32, (S, TP), 0).astype(f32)
    sx = jnp.maximum(1.0 - jnp.abs(rows - src_x), 0.0)       # (S, TP)
    sy = jnp.maximum(1.0 - jnp.abs(rows - src_y), 0.0)       # (S, TP)
    sx_b = sx.astype(bf16)                                   # single-pass MXU RHS

    # Per-channel chunks: MXU contracts x, VPU/XLU reduce y.  Chunking keeps
    # the (S, TP) intermediate in vregs (no VMEM round trip) and avoids any
    # sublane-splitting reshape of a (C*S, TP) tmp.
    for c in range(C):
        img_c = image_ref[0, c * S:(c + 1) * S, :].astype(bf16)    # (S, S)
        tmp = jnp.dot(img_c, sx_b, preferred_element_type=f32)     # (S, TP)
        out_c = jnp.sum(tmp * sy, axis=0, keepdims=True)           # (1, TP)
        out_ref[0, c:c + 1, :] = out_c.astype(out_ref.dtype)


def _choose_tile(P, B, C, S):
    """Pick lane tile TP (multiple of 128) and padded pixel count P_pad.

    Prefers the largest tile that (a) keeps the per-step VMEM footprint well
    under v7x's smaller budget and (b) yields >= 2 total grid steps so both
    v7x TensorCores get work even at small batch.
    """
    P128 = -(-P // 128) * 128          # round P up to a full lane multiple

    def vmem_ok(tp):
        img = 2 * C * S * S * 4        # double-buffered image block (f32)
        io = 2 * (2 + C) * tp * 4      # double-buffered flow + out tiles
        work = (3 * S + 8) * tp * 4    # sx, sy, per-chunk tmp, coord vectors
        return img + io + work <= 20 * 1024 * 1024

    for tp in (512, 256, 128):
        if P128 % tp == 0 and B * (P128 // tp) >= 2 and vmem_ok(tp):
            return tp, P128
    return 128, P128


def warp_transformation(image, flow):
    """Pallas equivalent of WarpTransformation.forward(image, flow)."""
    B, C, H, W = image.shape
    assert H == W, "WarpTransformation semantics require square spatial dims"
    assert H >= 2, "base grid divides by (S - 1)"
    assert flow.shape == (B, 2, H, W)
    S = H
    P = S * S

    TP, P_pad = _choose_tile(P, B, C, S)
    n_t = P_pad // TP

    image_rows = image.reshape(B, C * S, S)       # rows = (c, y), cols = x
    flow_flat = flow.reshape(B, 2, P)             # lane-dense per-pixel flow
    if P_pad != P:
        flow_flat = jnp.pad(flow_flat, ((0, 0), (0, 0), (0, P_pad - P)))

    out_flat = pl.pallas_call(
        functools.partial(_warp_kernel, S=S, C=C),
        out_shape=jax.ShapeDtypeStruct((B, C, P_pad), image.dtype),
        grid_spec=pltpu.PrefetchScalarGridSpec(
            num_scalar_prefetch=0,
            grid=(B, n_t),                        # B outer: image resident per b
            in_specs=[
                pl.BlockSpec((1, C * S, S), lambda b, t: (b, 0, 0)),   # image
                pl.BlockSpec((1, 2, TP), lambda b, t: (b, 0, t)),      # flow tile
            ],
            out_specs=pl.BlockSpec((1, C, TP), lambda b, t: (b, 0, t)),
        ),
        compiler_params=pltpu.CompilerParams(
            dimension_semantics=("parallel", "parallel"),
            vmem_limit_bytes=32 * 1024 * 1024,
        ),
    )(image_rows, flow_flat)

    if P_pad != P:
        out_flat = out_flat[:, :, :P]
    # Output spatial shape is (W, H) == (S, S), indexed (i, j).
    return out_flat.reshape(B, C, S, S)


def warp_reference(image, flow):
    """Pure-JAX reference (same math as torch grid_sample border/bilinear/ac=False)."""
    B, C, H, W = image.shape
    ii = jnp.arange(W, dtype=jnp.float32)[:, None]     # (W, 1)
    jj = jnp.arange(H, dtype=jnp.float32)[None, :]     # (1, H)
    base_x = 2.0 * ii / (W - 1) - 1.0
    base_y = 2.0 * jj / (H - 1) - 1.0
    fx = flow[:, 0]
    fy = flow[:, 1]
    x_norm = 2.0 * (base_x[None] + fx) - 1.0
    y_norm = 2.0 * (base_y[None] + fy) - 1.0
    src_x = jnp.clip(((x_norm + 1.0) * W - 1.0) * 0.5, 0.0, W - 1.0)
    src_y = jnp.clip(((y_norm + 1.0) * H - 1.0) * 0.5, 0.0, H - 1.0)
    x0f = jnp.floor(src_x)
    y0f = jnp.floor(src_y)
    wx = src_x - x0f
    wy = src_y - y0f
    x0 = jnp.clip(x0f, 0, W - 1).astype(jnp.int32)
    x1 = jnp.clip(x0f + 1, 0, W - 1).astype(jnp.int32)
    y0 = jnp.clip(y0f, 0, H - 1).astype(jnp.int32)
    y1 = jnp.clip(y0f + 1, 0, H - 1).astype(jnp.int32)

    def one(img_b, y0b, y1b, x0b, x1b, wxb, wyb):
        g = lambda yi, xi: img_b[:, yi, xi]
        return (g(y0b, x0b) * ((1 - wyb) * (1 - wxb))
                + g(y0b, x1b) * ((1 - wyb) * wxb)
                + g(y1b, x0b) * (wyb * (1 - wxb))
                + g(y1b, x1b) * (wyb * wxb))

    return jax.vmap(one)(image, y0, y1, x0, x1, wx, wy)


if __name__ == "__main__":
    key = jax.random.PRNGKey(0)
    k_img, k_flow = jax.random.split(key)
    B, C, H, W = 2, 4, 16, 16
    image = jax.random.normal(k_img, (B, C, H, W), dtype=jnp.float32)
    flow = 0.1 * jax.random.normal(k_flow, (B, 2, H, W), dtype=jnp.float32)

    out = warp_transformation(image, flow)
    out = jax.block_until_ready(out)

    ref = warp_reference(image, flow)
    assert out.shape == (B, C, W, H)
    err = float(jnp.max(jnp.abs(out - ref)))
    # bf16 single-pass MXU path for the interpolation matmul -> ~1e-3 abs err.
    assert err < 5e-2, f"mismatch vs reference: max abs err {err}"
    print("KERNEL_OK")
</pallas_src>

<mosaic_0001>
module attributes {stable_mosaic.version = 11 : i64} {
  func.func @_warp_kernel(%arg0: i32, %arg1: i32, %arg2: memref<1x64x16xf32, #tpu.memory_space<vmem>>, %arg3: memref<1x2x256xf32, #tpu.memory_space<vmem>>, %arg4: memref<1x4x256xf32, #tpu.memory_space<vmem>>) attributes {dimension_semantics = [#tpu.dimension_semantics<parallel>, #tpu.dimension_semantics<parallel>], iteration_bounds = array<i64: 2, 1>, scalar_prefetch = 0 : i64, scratch_operands = 0 : i64, tpu.core_type = #tpu.core_type<tc>, window_params = [{transform_indices = @transform_0, window_bounds = array<i64: 1, 64, 16>}, {transform_indices = @transform_1, window_bounds = array<i64: 1, 2, 256>}, {transform_indices = @transform_2, window_bounds = array<i64: 1, 4, 256>}]} {
    %c256_i32 = arith.constant 256 : i32
    %0 = arith.muli %arg1, %c256_i32 : i32
    %1 = tpu.iota {dimensions = array<i32: 1>} : vector<1x256xi32>
    %2 = vector.broadcast %0 : i32 to vector<1x256xi32>
    %3 = arith.addi %2, %1 : vector<1x256xi32>
    %4 = arith.sitofp %3 : vector<1x256xi32> to vector<1x256xf32>
    %cst = arith.constant 6.250000e-02 : f32
    %5 = vector.broadcast %cst : f32 to vector<1x256xf32>
    %6 = arith.mulf %4, %5 : vector<1x256xf32>
    %7 = math.floor %6 : vector<1x256xf32>
    %cst_0 = arith.constant 1.000000e+00 : f32
    %8 = vector.broadcast %cst_0 : f32 to vector<1x256xf32>
    %9 = arith.addf %7, %8 : vector<1x256xf32>
    %cst_1 = arith.constant 1.600000e+01 : f32
    %10 = vector.broadcast %cst_1 : f32 to vector<1x256xf32>
    %11 = arith.mulf %9, %10 : vector<1x256xf32>
    %12 = arith.cmpf ole, %11, %4 : vector<1x256xf32>
    %13 = arith.extui %12 : vector<1x256xi1> to vector<1x256xi32>
    %14 = arith.sitofp %13 : vector<1x256xi32> to vector<1x256xf32>
    %15 = arith.addf %7, %14 : vector<1x256xf32>
    %cst_2 = arith.constant 1.600000e+01 : f32
    %16 = vector.broadcast %cst_2 : f32 to vector<1x256xf32>
    %17 = arith.mulf %7, %16 : vector<1x256xf32>
    %18 = arith.cmpf ogt, %17, %4 : vector<1x256xf32>
    %19 = arith.extui %18 : vector<1x256xi1> to vector<1x256xi32>
    %20 = arith.sitofp %19 : vector<1x256xi32> to vector<1x256xf32>
    %21 = arith.subf %15, %20 : vector<1x256xf32>
    %cst_3 = arith.constant 1.600000e+01 : f32
    %22 = vector.broadcast %cst_3 : f32 to vector<1x256xf32>
    %23 = arith.mulf %21, %22 : vector<1x256xf32>
    %24 = arith.subf %4, %23 : vector<1x256xf32>
    %cst_4 = arith.constant 0.13333334 : f32
    %25 = vector.broadcast %cst_4 : f32 to vector<1x256xf32>
    %26 = arith.mulf %21, %25 : vector<1x256xf32>
    %cst_5 = arith.constant 1.000000e+00 : f32
    %27 = vector.broadcast %cst_5 : f32 to vector<1x256xf32>
    %28 = arith.subf %26, %27 : vector<1x256xf32>
    %cst_6 = arith.constant 0.13333334 : f32
    %29 = vector.broadcast %cst_6 : f32 to vector<1x256xf32>
    %30 = arith.mulf %24, %29 : vector<1x256xf32>
    %cst_7 = arith.constant 1.000000e+00 : f32
    %31 = vector.broadcast %cst_7 : f32 to vector<1x256xf32>
    %32 = arith.subf %30, %31 : vector<1x256xf32>
    %c0 = arith.constant 0 : index
    %c0_8 = arith.constant 0 : index
    %c0_9 = arith.constant 0 : index
    %33 = vector.load %arg3[%c0, %c0_8, %c0_9] : memref<1x2x256xf32, #tpu.memory_space<vmem>>, vector<1x1x256xf32>
    %34 = vector.shape_cast %33 : vector<1x1x256xf32> to vector<1x256xf32>
    %c0_10 = arith.constant 0 : index
    %c1 = arith.constant 1 : index
    %c0_11 = arith.constant 0 : index
    %35 = vector.load %arg3[%c0_10, %c1, %c0_11] : memref<1x2x256xf32, #tpu.memory_space<vmem>>, vector<1x1x256xf32>
    %36 = vector.shape_cast %35 : vector<1x1x256xf32> to vector<1x256xf32>
    %37 = arith.addf %28, %34 : vector<1x256xf32>
    %cst_12 = arith.constant 2.000000e+00 : f32
    %38 = vector.broadcast %cst_12 : f32 to vector<1x256xf32>
    %39 = arith.mulf %38, %37 : vector<1x256xf32>
    %cst_13 = arith.constant 1.000000e+00 : f32
    %40 = vector.broadcast %cst_13 : f32 to vector<1x256xf32>
    %41 = arith.subf %39, %40 : vector<1x256xf32>
    %42 = arith.addf %32, %36 : vector<1x256xf32>
    %cst_14 = arith.constant 2.000000e+00 : f32
    %43 = vector.broadcast %cst_14 : f32 to vector<1x256xf32>
    %44 = arith.mulf %43, %42 : vector<1x256xf32>
    %cst_15 = arith.constant 1.000000e+00 : f32
    %45 = vector.broadcast %cst_15 : f32 to vector<1x256xf32>
    %46 = arith.subf %44, %45 : vector<1x256xf32>
    %cst_16 = arith.constant 1.000000e+00 : f32
    %47 = vector.broadcast %cst_16 : f32 to vector<1x256xf32>
    %48 = arith.addf %41, %47 : vector<1x256xf32>
    %cst_17 = arith.constant 1.600000e+01 : f32
    %49 = vector.broadcast %cst_17 : f32 to vector<1x256xf32>
    %50 = arith.mulf %48, %49 : vector<1x256xf32>
    %cst_18 = arith.constant 1.000000e+00 : f32
    %51 = vector.broadcast %cst_18 : f32 to vector<1x256xf32>
    %52 = arith.subf %50, %51 : vector<1x256xf32>
    %cst_19 = arith.constant 5.000000e-01 : f32
    %53 = vector.broadcast %cst_19 : f32 to vector<1x256xf32>
    %54 = arith.mulf %52, %53 : vector<1x256xf32>
    %cst_20 = arith.constant 0.000000e+00 : f32
    %cst_21 = arith.constant 1.500000e+01 : f32
    %55 = vector.broadcast %cst_20 : f32 to vector<1x256xf32>
    %56 = arith.maximumf %55, %54 : vector<1x256xf32>
    %57 = vector.broadcast %cst_21 : f32 to vector<1x256xf32>
    %58 = arith.minimumf %57, %56 : vector<1x256xf32>
    %cst_22 = arith.constant 1.000000e+00 : f32
    %59 = vector.broadcast %cst_22 : f32 to vector<1x256xf32>
    %60 = arith.addf %46, %59 : vector<1x256xf32>
    %cst_23 = arith.constant 1.600000e+01 : f32
    %61 = vector.broadcast %cst_23 : f32 to vector<1x256xf32>
    %62 = arith.mulf %60, %61 : vector<1x256xf32>
    %cst_24 = arith.constant 1.000000e+00 : f32
    %63 = vector.broadcast %cst_24 : f32 to vector<1x256xf32>
    %64 = arith.subf %62, %63 : vector<1x256xf32>
    %cst_25 = arith.constant 5.000000e-01 : f32
    %65 = vector.broadcast %cst_25 : f32 to vector<1x256xf32>
    %66 = arith.mulf %64, %65 : vector<1x256xf32>
    %cst_26 = arith.constant 0.000000e+00 : f32
    %cst_27 = arith.constant 1.500000e+01 : f32
    %67 = vector.broadcast %cst_26 : f32 to vector<1x256xf32>
    %68 = arith.maximumf %67, %66 : vector<1x256xf32>
    %69 = vector.broadcast %cst_27 : f32 to vector<1x256xf32>
    %70 = arith.minimumf %69, %68 : vector<1x256xf32>
    %71 = tpu.iota {dimensions = array<i32: 0>} : vector<16x256xi32>
    %72 = arith.sitofp %71 : vector<16x256xi32> to vector<16x256xf32>
    %73 = vector.broadcast %58 : vector<1x256xf32> to vector<16x256xf32>
    %74 = arith.subf %72, %73 : vector<16x256xf32>
    %75 = math.absf %74 : vector<16x256xf32>
    %cst_28 = arith.constant 1.000000e+00 : f32
    %76 = vector.broadcast %cst_28 : f32 to vector<16x256xf32>
    %77 = arith.subf %76, %75 : vector<16x256xf32>
    %cst_29 = arith.constant 0.000000e+00 : f32
    %78 = vector.broadcast %cst_29 : f32 to vector<16x256xf32>
    %79 = arith.maximumf %77, %78 : vector<16x256xf32>
    %80 = vector.broadcast %70 : vector<1x256xf32> to vector<16x256xf32>
    %81 = arith.subf %72, %80 : vector<16x256xf32>
    %82 = math.absf %81 : vector<16x256xf32>
    %cst_30 = arith.constant 1.000000e+00 : f32
    %83 = vector.broadcast %cst_30 : f32 to vector<16x256xf32>
    %84 = arith.subf %83, %82 : vector<16x256xf32>
    %cst_31 = arith.constant 0.000000e+00 : f32
    %85 = vector.broadcast %cst_31 : f32 to vector<16x256xf32>
    %86 = arith.maximumf %84, %85 : vector<16x256xf32>
    %87 = arith.truncf %79 : vector<16x256xf32> to vector<16x256xbf16>
    %c0_32 = arith.constant 0 : index
    %c0_33 = arith.constant 0 : index
    %c0_34 = arith.constant 0 : index
    %88 = vector.load %arg2[%c0_32, %c0_33, %c0_34] : memref<1x64x16xf32, #tpu.memory_space<vmem>>, vector<1x16x16xf32>
    %89 = vector.shape_cast %88 : vector<1x16x16xf32> to vector<16x16xf32>
    %90 = arith.truncf %89 : vector<16x16xf32> to vector<16x16xbf16>
    %cst_35 = arith.constant dense<0.000000e+00> : vector<16x256xf32>
    %91 = tpu.matmul %90, %87, %cst_35 {dimension_numbers = #tpu.dot_dimension_numbers<[1], [0], [0], [1], [0, 0, 1, 1], [], []>} : vector<16x16xbf16>, vector<16x256xbf16>, vector<16x256xf32> -> vector<16x256xf32>
    %92 = arith.mulf %91, %86 : vector<16x256xf32>
    %cst_36 = arith.constant dense<0.000000e+00> : vector<256xf32>
    %93 = vector.multi_reduction <add>, %92, %cst_36 [0] : vector<16x256xf32> to vector<256xf32>
    %94 = vector.shape_cast %93 : vector<256xf32> to vector<1x256xf32>
    %c0_37 = arith.constant 0 : index
    %c0_38 = arith.constant 0 : index
    %c0_39 = arith.constant 0 : index
    %95 = vector.load %arg4[%c0_37, %c0_38, %c0_39] : memref<1x4x256xf32, #tpu.memory_space<vmem>>, vector<1x1x256xf32>
    %96 = vector.shape_cast %95 : vector<1x1x256xf32> to vector<1x256xf32>
    %97 = vector.shape_cast %94 : vector<1x256xf32> to vector<1x1x256xf32>
    tpu.vector_store %arg4[%c0_37, %c0_38, %c0_39], %97 {strides = array<i32>} : memref<1x4x256xf32, #tpu.memory_space<vmem>>, vector<1x1x256xf32>,
    %c0_40 = arith.constant 0 : index
    %c16 = arith.constant 16 : index
    %c0_41 = arith.constant 0 : index
    %98 = vector.load %arg2[%c0_40, %c16, %c0_41] : memref<1x64x16xf32, #tpu.memory_space<vmem>>, vector<1x16x16xf32>
    %99 = vector.shape_cast %98 : vector<1x16x16xf32> to vector<16x16xf32>
    %100 = arith.truncf %99 : vector<16x16xf32> to vector<16x16xbf16>
    %cst_42 = arith.constant dense<0.000000e+00> : vector<16x256xf32>
    %101 = tpu.matmul %100, %87, %cst_42 {dimension_numbers = #tpu.dot_dimension_numbers<[1], [0], [0], [1], [0, 0, 1, 1], [], []>} : vector<16x16xbf16>, vector<16x256xbf16>, vector<16x256xf32> -> vector<16x256xf32>
    %102 = arith.mulf %101, %86 : vector<16x256xf32>
    %cst_43 = arith.constant dense<0.000000e+00> : vector<256xf32>
    %103 = vector.multi_reduction <add>, %102, %cst_43 [0] : vector<16x256xf32> to vector<256xf32>
    %104 = vector.shape_cast %103 : vector<256xf32> to vector<1x256xf32>
    %c0_44 = arith.constant 0 : index
    %c1_45 = arith.constant 1 : index
    %c0_46 = arith.constant 0 : index
    %105 = vector.load %arg4[%c0_44, %c1_45, %c0_46] : memref<1x4x256xf32, #tpu.memory_space<vmem>>, vector<1x1x256xf32>
    %106 = vector.shape_cast %105 : vector<1x1x256xf32> to vector<1x256xf32>
    %107 = vector.shape_cast %104 : vector<1x256xf32> to vector<1x1x256xf32>
    tpu.vector_store %arg4[%c0_44, %c1_45, %c0_46], %107 {strides = array<i32>} : memref<1x4x256xf32, #tpu.memory_space<vmem>>, vector<1x1x256xf32>,
    %c0_47 = arith.constant 0 : index
    %c32 = arith.constant 32 : index
    %c0_48 = arith.constant 0 : index
    %108 = vector.load %arg2[%c0_47, %c32, %c0_48] : memref<1x64x16xf32, #tpu.memory_space<vmem>>, vector<1x16x16xf32>
    %109 = vector.shape_cast %108 : vector<1x16x16xf32> to vector<16x16xf32>
    %110 = arith.truncf %109 : vector<16x16xf32> to vector<16x16xbf16>
    %cst_49 = arith.constant dense<0.000000e+00> : vector<16x256xf32>
    %111 = tpu.matmul %110, %87, %cst_49 {dimension_numbers = #tpu.dot_dimension_numbers<[1], [0], [0], [1], [0, 0, 1, 1], [], []>} : vector<16x16xbf16>, vector<16x256xbf16>, vector<16x256xf32> -> vector<16x256xf32>
    %112 = arith.mulf %111, %86 : vector<16x256xf32>
    %cst_50 = arith.constant dense<0.000000e+00> : vector<256xf32>
    %113 = vector.multi_reduction <add>, %112, %cst_50 [0] : vector<16x256xf32> to vector<256xf32>
    %114 = vector.shape_cast %113 : vector<256xf32> to vector<1x256xf32>
    %c0_51 = arith.constant 0 : index
    %c2 = arith.constant 2 : index
    %c0_52 = arith.constant 0 : index
    %115 = vector.load %arg4[%c0_51, %c2, %c0_52] : memref<1x4x256xf32, #tpu.memory_space<vmem>>, vector<1x1x256xf32>
    %116 = vector.shape_cast %115 : vector<1x1x256xf32> to vector<1x256xf32>
    %117 = vector.shape_cast %114 : vector<1x256xf32> to vector<1x1x256xf32>
    tpu.vector_store %arg4[%c0_51, %c2, %c0_52], %117 {strides = array<i32>} : memref<1x4x256xf32, #tpu.memory_space<vmem>>, vector<1x1x256xf32>,
    %c0_53 = arith.constant 0 : index
    %c48 = arith.constant 48 : index
    %c0_54 = arith.constant 0 : index
    %118 = vector.load %arg2[%c0_53, %c48, %c0_54] : memref<1x64x16xf32, #tpu.memory_space<vmem>>, vector<1x16x16xf32>
    %119 = vector.shape_cast %118 : vector<1x16x16xf32> to vector<16x16xf32>
    %120 = arith.truncf %119 : vector<16x16xf32> to vector<16x16xbf16>
    %cst_55 = arith.constant dense<0.000000e+00> : vector<16x256xf32>
    %121 = tpu.matmul %120, %87, %cst_55 {dimension_numbers = #tpu.dot_dimension_numbers<[1], [0], [0], [1], [0, 0, 1, 1], [], []>} : vector<16x16xbf16>, vector<16x256xbf16>, vector<16x256xf32> -> vector<16x256xf32>
    %122 = arith.mulf %121, %86 : vector<16x256xf32>
    %cst_56 = arith.constant dense<0.000000e+00> : vector<256xf32>
    %123 = vector.multi_reduction <add>, %122, %cst_56 [0] : vector<16x256xf32> to vector<256xf32>
    %124 = vector.shape_cast %123 : vector<256xf32> to vector<1x256xf32>
    %c0_57 = arith.constant 0 : index
    %c3 = arith.constant 3 : index
    %c0_58 = arith.constant 0 : index
    %125 = vector.load %arg4[%c0_57, %c3, %c0_58] : memref<1x4x256xf32, #tpu.memory_space<vmem>>, vector<1x1x256xf32>
    %126 = vector.shape_cast %125 : vector<1x1x256xf32> to vector<1x256xf32>
    %127 = vector.shape_cast %124 : vector<1x256xf32> to vector<1x1x256xf32>
    tpu.vector_store %arg4[%c0_57, %c3, %c0_58], %127 {strides = array<i32>} : memref<1x4x256xf32, #tpu.memory_space<vmem>>, vector<1x1x256xf32>,
    return
  }
  func.func @transform_0(%arg0: i32, %arg1: i32) -> (i32, i32, i32) {
    %c0_i32 = arith.constant 0 : i32
    %c0_i32_0 = arith.constant 0 : i32
    %c0_i32_1 = arith.constant 0 : i32
    return %arg0, %c0_i32, %c0_i32_0 : i32, i32, i32
  }
  func.func @transform_1(%arg0: i32, %arg1: i32) -> (i32, i32, i32) {
    %c0_i32 = arith.constant 0 : i32
    %c0_i32_0 = arith.constant 0 : i32
    return %arg0, %c0_i32, %arg1 : i32, i32, i32
  }
  func.func @transform_2(%arg0: i32, %arg1: i32) -> (i32, i32, i32) {
    %c0_i32 = arith.constant 0 : i32
    %c0_i32_0 = arith.constant 0 : i32
    return %arg0, %c0_i32, %arg1 : i32, i32, i32
  }
}

</mosaic_0001>

<bundles_post_ra>
// kernel: tpu_custom_call.1
= control target key start
LH: loop header
LB: loop body
LE: loop exit
PB: predicated region body
PF: predicated region fallthrough
CT: control target
= control target key end

     0   :  { %7 = vsyncpa [#allocation3], 0  ;;  %s1198_s0 = inlined_call_operand.vmem [shape: f32[2,64,16], index: 0, kind: input, shape index: {}]   ;;  %s1199_s1 = inlined_call_operand.vmem [shape: f32[2,2,256], index: 1, kind: input, shape index: {}]   ;;  %s1200_s2 = inlined_call_operand.hbm [shape: f32[2,4,256], index: 2, kind: output, shape index: {}]  }
   0x1   :  { %9 = vsyncpa [#allocation3 + $0x1], 0  ;;  %s1011_s9 = smov 0   ;;  %s1013_s10 = smov 0  }
   0x2   :  { %s1015_s11 = smov 0   ;;  %s1017_s12 = smov 0  }
   0x3   :  { %s1019_s13 = smov 0   ;;  %s1021_s14 = smov 0  }
   0x4 LB: > { %s814_s15 = sadd.s32 4294967295, %s990_s14   ;;  %s815_s16 = sadd.s32 4294967294, %s990_s14   ;;  %s990_s14 = sphi %s1021_s14, %s15_s14   ;;  %s986_s13 = sphi %s1019_s13, %s1209_s13   ;;  %s982_s12 = sphi %s1017_s12, %s1208_s12   ;;  %s978_s11 = sphi %s1015_s11, %s1207_s11   ;;  %s974_s10 = sphi %s1013_s10, %s1206_s10   ;;  %s970_s9 = sphi %s1011_s9, %s1205_s9  }
   0x5   : > { %s27_s17 = sadd.s32 1, %s986_s13  ;;  %s90_s18 = sadd.s32 1, %s978_s11 }
   0x6   : > { %p29_p0 = scmp.ge.s32.totalorder %s27_s17, 2  ;;  %p100_p1 = scmp.ne.s32.totalorder %s978_s11, %s974_s10 }
   0x7   : > { %p101_p2 = scmp.eq.s32.totalorder %s814_s15, 1  ;;  %p106_p3 = scmp.ne.s32.totalorder %s974_s10, %s970_s9 }
   0x8   : > { %s1211_s17 = smov (%p29_p0, %s27_s17), 0  ;;  %p107_p5 = scmp.eq.s32.totalorder %s815_s16, 1 }
   0x9   : > { %p1051_p4 = por %p101_p2, %p100_p1  ;;  %s85_s20 = ssub.s32 %s986_s13, %s1211_s17 }
   0xa   : > { %p818_p6 = scmp.ge.s32.totalorder %s990_s14, 1  ;;  %p88_p7 = scmp.eq.s32.totalorder %s85_s20, 0 }
   0xb   : > { %p1058_p8 = por %p107_p5, %p106_p3  ;;  %p146_p9 = scmp.lt.s32.totalorder %s990_s14, 3 }
   0xc   : > { %s1064_s22 = scalar_select %p88_p7, %s978_s11, %s90_s18  }
   0xd   : > { %p147_p10 = pnand %p818_p6, %p146_p9 }
   0xe   : > { %p177_p11 = scmp.lt.s32.totalorder (!%p147_p10), %s982_s12, 1  ;;  %s174_s4 = sand.u32 (!%p147_p10), 1, %s974_s10  }
   0xf   : > { %150 = sbr.rel (%p147_p10) target bundleno = 323 (0x143), region = 28  ;;  %s819_s5 = sshll.u32 (!%p147_p10), %s174_s4, 3 }
  0x10   : > { %s176_s6 = scalar_lea.vmem (!%p147_p10), [#allocation2], %s819_s5  ;;  %s855_s7 = sshll.u32 (!%p147_p10), %s982_s12, 7 }
  0x11   : > { %s726_s8 = sshll.u32 (!%p147_p10), %s176_s6, 4  ;;  %s1152_s18 = scalar_lea.hbm (!%p147_p10), %s1200_s2, %s855_s7  ;;  %s727_s8 = int_to_ptr.vmem [resolvable:$true] %s726_s8 }
  0x12   : > { %s710_s20 = scalar_lea.sflag (!%p147_p10), [#allocation3], %s174_s4 }
  0x14   : > { %v195_v0 = vlaneseq  ;;  %v992_v1 = vmov 0   ;;  %s1073_s23 = scalar_select %p177_p11, %s982_s12, 1  ;;  %v993_v17 = vmov 0.0   ;;  %vm360_vm4 = vcmask 130048  }
  0x15   : > { %396 = vmatprep.mubr.bf16.mxu0 %v992_v1  ;;  %486 = vmatprep.mubr.bf16.mxu1 %v992_v1  ;;  %s914_s12 = scalar_lea.vmem %s727_s8, 128 }
  0x16   : > { %v196_v2 = vand.u32 127, %v195_v0  ;;  %s854_s24 = sshll.u32 %s1073_s23, 2  ;;  %v1078_v14 = vshrl.u32 %v195_v0, 7  ;;  %s853_s28 = sshll.u32 %s1073_s23, 6  ;;  %vm1140_vm5 = vcmp.lt.s32.totalorder %v195_v0, 256 }
  0x17   : > { %s190_s27 = scalar_lea.vmem %s1199_s1, %s854_s24  ;;  %s181_s3 = scalar_lea.vmem %s1198_s0, %s853_s28 }
  0x18   : > { %v197_v3 = vadd.s32 128, %v196_v2  ;;  %v201_v4 = vcvt.s32.f32 %v196_v2  ;;  %v1086_v22 = vsub.s32 0, %v1078_v14  ;;  %v241_v25 = vld [vmem:[%s190_s27] ss:$2 sm:$0x3]  ;;  %v251_v26 = vsub.s32 1, %v1078_v14  ;;  %p915_p12 = scmp.ne.s32.totalorder %s727_s8, %s914_s12 }
  0x19   : > { %v1095_v34 = vld [vmem:[%s190_s27 + $0x1] ss:$2 sm:$0x3]  ;;  %v304_v54 = vadd.s32 8, %v1078_v14  ;;  %v1103_v59 = vcvt.s32.f32 %v1078_v14  ;;  %s995_s23 = smov [#allocation2]  }
  0x1a   : > { %v1070_v5 = vcvt.s32.f32 %v197_v3  ;;  %v203_v6 = vmul.f32 0.0625, %v201_v4  ;;  %v248_v30 = vrot.slane %v241_v25, %v1086_v22  ;;  %v252_v33 = vrot.slane %v241_v25, %v251_v26  ;;  %v448_v25 = vld [vmem:[%s181_s3 + $0x10] sm:$0xff]  ;;  %p916_p13 = pnand %p915_p12, %p1051_p4  ;;  %s918_s24 = sshll.u32 %s995_s23, 4  ;;  %s919_s24 = int_to_ptr.vmem [resolvable:$false] %s918_s24 }
  0x1b   : > { %v265_v40 = vrot.slane %v1095_v34, %v1086_v22  ;;  %v1105_v60 = vcvt.s32.f32 %v304_v54  ;;  %s920_s25 = scalar_lea.vmem %s919_s24, 256  ;;  %p921_p1 = scmp.lt.s32.totalorder %s727_s8, %s919_s24 }
  0x1c   : > { %v204_v7 = vmul.f32 0.0625, %v1070_v5  ;;  %v205_v8 = vfloor.f32 %v203_v6  ;;  %p917_p0 = pneg %p916_p13  ;;  %p922_p2 = scmp.lt.s32.totalorder %s920_s25, %s914_s12 }
  0x1e   : > { %v206_v9 = vfloor.f32 %v204_v7  ;;  %v207_v10 = vadd.f32 1.0, %v205_v8  ;;  %v219_v11 = vmul.f32 16.0, %v205_v8  ;;  %p923_p3 = por %p922_p2, %p921_p1 }
  0x20   : > { %v208_v12 = vadd.f32 1.0, %v206_v9  ;;  %v220_v13 = vmul.f32 16.0, %v206_v9  ;;  %v209_v15 = vmul.f32 16.0, %v207_v10  ;;  %vm221_vm0 = vcmp.gt.f32.partialorder %v219_v11, %v201_v4  ;;  %p924_p5 = pnand %p923_p3, %p917_p0 }
  0x21   : > { %v826_v19 = vsel %vm221_vm0, 1.0, %v993_v17 }
  0x22   : > { %v210_v16 = vmul.f32 16.0, %v208_v12  ;;  %vm222_vm1 = vcmp.gt.f32.partialorder %v220_v13, %v1070_v5  ;;  %vm211_vm2 = vcmp.le.f32.partialorder %v209_v15, %v201_v4 }
  0x23   : > { %v824_v18 = vsel %vm211_vm2, 1.0, %v993_v17  ;;  %v827_v21 = vsel %vm222_vm1, 1.0, %v993_v17 }
  0x24   : > { %vm212_vm3 = vcmp.le.f32.partialorder %v210_v16, %v1070_v5  ;;  %v217_v23 = vadd.f32 %v824_v18, %v205_v8 }
  0x25   : > { %v825_v20 = vsel %vm212_vm3, 1.0, %v993_v17 }
  0x26   : > { %v218_v24 = vadd.f32 %v825_v20, %v206_v9  ;;  %v227_v27 = vsub.f32 %v217_v23, %v826_v19 }
  0x28   : > { %v1089_v28 = vsub.f32 %v218_v24, %v827_v21  ;;  %v233_v29 = vmul.f32 0.13333334, %v227_v27  ;;  %v229_v31 = vmul.f32 16.0, %v227_v27  ;;  %v357_v21 = vld [vmem:[%s181_s3] sm:$0xff]  ;;  %v358_v24 = vld [vmem:[%s181_s3 + $0x8] sm:$0xff]  ;;  %v449_v27 = vld [vmem:[%s181_s3 + $0x18] sm:$0xff] }
  0x2a   : > { %v234_v32 = vmul.f32 0.13333334, %v1089_v28  ;;  %v828_v35 = vadd.f32 -1.0, %v233_v29  ;;  %v231_v36 = vsub.f32 %v201_v4, %v229_v31  ;;  %v450_v31 = vpack.c.bf16 %v449_v27, %v448_v25 }
  0x2c   : > { %v829_v37 = vadd.f32 -1.0, %v234_v32  ;;  %v255_v38 = vadd.f32 %v828_v35, %v248_v30  ;;  %v237_v39 = vmul.f32 0.13333334, %v231_v36  ;;  %v359_v30 = vpack.c.bf16 %v358_v24, %v357_v21  ;;  %v535_v32 = vld [vmem:[%s181_s3 + $0x20] sm:$0xff]  ;;  %v622_v35 = vld [vmem:[%s181_s3 + $0x30] sm:$0xff]  ;;  %v623_v36 = vld [vmem:[%s181_s3 + $0x38] sm:$0xff] }
  0x2e   : > { %v256_v41 = vadd.f32 %v829_v37, %v252_v33  ;;  %v257_v42 = vmul.f32 2.0, %v255_v38  ;;  %v830_v43 = vadd.f32 -1.0, %v237_v39  ;;  %v536_v33 = vld [vmem:[%s181_s3 + $0x28] sm:$0xff]  ;;  %v624_v38 = vpack.c.bf16 %v623_v36, %v622_v35 }
  0x2f   : > { %v537_v37 = vpack.c.bf16 %v536_v33, %v535_v32  ;;  %v230_v39 = vmul.f32 16.0, %v1089_v28  ;;  %v994_v35 = vmov 1966171168  }
  0x30   : > { %v258_v44 = vmul.f32 2.0, %v256_v41  ;;  %v833_v45 = vadd.f32 -1.0, %v257_v42  ;;  %v1099_v46 = vadd.f32 %v830_v43, %v265_v40  ;;  %v269_v43 = vrot.slane %v1095_v34, %v251_v26 }
  0x31   : > { %v232_v40 = vsub.f32 %v1070_v5, %v230_v39  ;;  %v429_v36 = vunpack.c.l.s4 %v994_v35 }
  0x32   : > { %v834_v47 = vadd.f32 -1.0, %v258_v44  ;;  %v278_v48 = vadd.f32 1.0, %v833_v45  ;;  %v274_v45 = vmul.f32 2.0, %v1099_v46 }
  0x33   : > { %v238_v41 = vmul.f32 0.13333334, %v232_v40 }
  0x34   : > { %v279_v49 = vadd.f32 1.0, %v834_v47  ;;  %v280_v50 = vmul.f32 16.0, %v278_v48  ;;  %v835_v47 = vadd.f32 -1.0, %v274_v45 }
  0x35   : > { %v831_v42 = vadd.f32 -1.0, %v238_v41 }
  0x36   : > { %v281_v51 = vmul.f32 16.0, %v279_v49  ;;  %v837_v52 = vadd.f32 -1.0, %v280_v50  ;;  %v290_v49 = vadd.f32 1.0, %v835_v47 }
  0x37   : > { %v273_v44 = vadd.f32 %v831_v42, %v269_v43 }
  0x38   : > { %v838_v53 = vadd.f32 -1.0, %v281_v51  ;;  %v284_v55 = vmul.f32 0.5, %v837_v52  ;;  %v292_v51 = vmul.f32 16.0, %v290_v49  ;;  %v430_v49 = vunpack.c.0.s8 %v429_v36 }
  0x3a   : > { %v285_v56 = vmul.f32 0.5, %v838_v53  ;;  %v286_v57 = vmax.f32 %v284_v55, 0.0  ;;  %v839_v53 = vadd.f32 -1.0, %v292_v51 }
  0x3c   : > { %v287_v58 = vmax.f32 %v285_v56, 0.0  ;;  %v288_v61 = vmin.f32 %v286_v57, 15.0  ;;  %v296_v54 = vmul.f32 0.5, %v839_v53 }
  0x3e   : > { %v289_v62 = vmin.f32 %v287_v58, 15.0  ;;  %v310_v63 = vrot.slane %v288_v61, %v1086_v22  ;;  %v298_v55 = vmax.f32 %v296_v54, 0.0 }
  0x40   : > { %v314_v2 = vrot.slane %v289_v62, %v1086_v22  ;;  %v315_v3 = vsub.f32 %v1103_v59, %v310_v63  ;;  %v317_v4 = vsub.f32 %v1105_v60, %v310_v63  ;;  %v300_v57 = vmin.f32 %v298_v55, 15.0 }
  0x42   : > { %v316_v6 = vsub.f32 %v1103_v59, %v314_v2  ;;  %v318_v7 = vsub.f32 %v1105_v60, %v314_v2  ;;  %v319_v8 = vand.u32 2147483647, %v315_v3  ;;  %v321_v9 = vand.u32 2147483647, %v317_v4 }
  0x43   : > { %v334_v26 = vrot.slane %v300_v57, %v1086_v22 }
  0x44   : > { %v320_v10 = vand.u32 2147483647, %v316_v6  ;;  %v322_v11 = vand.u32 2147483647, %v318_v7  ;;  %v323_v12 = vsub.f32 1.0, %v319_v8  ;;  %v325_v13 = vsub.f32 1.0, %v321_v9 }
  0x45   : > { %v339_v46 = vsub.f32 %v1103_v59, %v334_v26  ;;  %v341_v61 = vsub.f32 %v1105_v60, %v334_v26 }
  0x46   : > { %v324_v15 = vsub.f32 1.0, %v320_v10  ;;  %v326_v16 = vsub.f32 1.0, %v322_v11  ;;  %v327_v17 = vmax.f32 %v323_v12, 0.0  ;;  %v329_v18 = vmax.f32 %v325_v13, 0.0 }
  0x47   : > { %v343_v2 = vand.u32 2147483647, %v339_v46  ;;  %v345_v3 = vand.u32 2147483647, %v341_v61 }
  0x48   : > { %v328_v19 = vmax.f32 %v324_v15, 0.0  ;;  %v330_v20 = vmax.f32 %v326_v16, 0.0  ;;  %v355_v23 = vpack.c.bf16 %v329_v18, %v327_v17 }
  0x49   : > { %v347_v7 = vsub.f32 1.0, %v343_v2  ;;  %v349_v8 = vsub.f32 1.0, %v345_v3 }
  0x4a   : > { %v356_v29 = vpack.c.bf16 %v330_v20, %v328_v19 }
  0x4b   : > { %v351_v13 = vmax.f32 %v347_v7, 0.0 }
  0x4c   : > { %378 = vmatprep.subr.bf16.mxu0 %v356_v29  ;;  %468 = vmatprep.subr.bf16.mxu1 %v356_v29 }
  0x4d   : > { %379 = vmatpush1.bf16.msra.mxu0 %v355_v23  ;;  %469 = vmatpush1.bf16.msra.mxu1 %v355_v23 }
  0x4e   : > { %555 = vmatprep.subr.bf16.mxu0 %v356_v29  ;;  %642 = vmatprep.subr.bf16.mxu1 %v356_v29 }
  0x50   : > { %841 = vmatmul.mubr.msk.bf16.vlgmr.msra.gmra.mxu0 %vm360_vm4, %v359_v30  ;;  %842 = vmatmul.mubr.msk.bf16.vlgmr.msra.gmra.mxu1 %vm360_vm4, %v450_v31 }
  0x51   : > { %556 = vmatpush1.bf16.msra.mxu0 %v355_v23  ;;  %643 = vmatpush1.bf16.msra.mxu1 %v355_v23 }
  0x52   : > { %573 = vmatprep.mubr.bf16.mxu0 %v992_v1  ;;  %660 = vmatprep.mubr.bf16.mxu1 %v992_v1  ;;  %v275_v1 = vmul.f32 2.0, %v273_v44 }
  0x54   : > { %v836_v48 = vadd.f32 -1.0, %v275_v1 }
  0x56   : > { %v291_v50 = vadd.f32 1.0, %v836_v48 }
  0x58   : > { %844 = vmatmul.mubr.msk.bf16.vlgmr.msra.gmra.mxu0 %vm360_vm4, %v537_v37  ;;  %846 = vmatmul.mubr.msk.bf16.vlgmr.msra.gmra.mxu1 %vm360_vm4, %v624_v38  ;;  %v293_v52 = vmul.f32 16.0, %v291_v50 }
  0x5a   : > { %v840_v28 = vadd.f32 -1.0, %v293_v52 }
  0x5c   : > { %v297_v5 = vmul.f32 0.5, %v840_v28 }
  0x5e   : > { %v299_v56 = vmax.f32 %v297_v5, 0.0 }
  0x60   : > { %v301_v58 = vmin.f32 %v299_v56, 15.0 }
  0x62   : > { %v338_v34 = vrot.slane %v301_v58, %v1086_v22  ;;  %v353_v22 = vmax.f32 %v349_v8, 0.0 }
  0x64   : > { %v340_v62 = vsub.f32 %v1103_v59, %v338_v34  ;;  %v342_v63 = vsub.f32 %v1105_v60, %v338_v34 }
  0x66   : > { %v344_v4 = vand.u32 2147483647, %v340_v62  ;;  %v346_v6 = vand.u32 2147483647, %v342_v63 }
  0x68   : > { %v348_v9 = vsub.f32 1.0, %v344_v4  ;;  %v350_v10 = vsub.f32 1.0, %v346_v6 }
  0x6a   : > { %v352_v15 = vmax.f32 %v348_v9, 0.0  ;;  %v354_v18 = vmax.f32 %v350_v10, 0.0 }
 0x110   : > { %v398_v11 = vpop.f32.mrf.mxu0  ;;  %v488_v12 = vpop.f32.mrf.mxu1 }
 0x111   : > { %v407_v20 = vmul.f32 %v398_v11, %v351_v13  ;;  %v497_v60 = vmul.f32 %v488_v12, %v351_v13 }
 0x112   : > { %v400_v16 = vpop.f32.mrf.mxu0  ;;  %v490_v17 = vpop.f32.mrf.mxu1 }
 0x113   : > { %v408_v24 = vmul.f32 %v400_v16, %v352_v15  ;;  %v498_v25 = vmul.f32 %v490_v17, %v352_v15 }
 0x114   : > { %v402_v19 = vpop.f32.mrf.mxu0  ;;  %v492_v59 = vpop.f32.mrf.mxu1 }
 0x115   : > { %v409_v21 = vmul.f32 %v402_v19, %v353_v22  ;;  %v499_v23 = vmul.f32 %v492_v59, %v353_v22 }
 0x116   : > { %v404_v27 = vpop.f32.mrf.mxu0  ;;  %v494_v29 = vpop.f32.mrf.mxu1 }
 0x117   : > { %v411_v30 = vadd.f32 %v409_v21, %v407_v20  ;;  %v501_v31 = vadd.f32 %v499_v23, %v497_v60  ;;  %v410_v32 = vmul.f32 %v404_v27, %v354_v18  ;;  %v500_v33 = vmul.f32 %v494_v29, %v354_v18 }
 0x118   : > { %v575_v37 = vpop.f32.mrf.mxu0  ;;  %v662_v38 = vpop.f32.mrf.mxu1 }
 0x119   : > { %v412_v39 = vrot.slane %v411_v30, 4  ;;  %v502_v40 = vrot.slane %v501_v31, 4  ;;  %v418_v41 = vadd.f32 %v410_v32, %v408_v24  ;;  %v508_v42 = vadd.f32 %v500_v33, %v498_v25 }
 0x11a   : > { %v577_v43 = vpop.f32.mrf.mxu0  ;;  %v664_v44 = vpop.f32.mrf.mxu1  ;;  %v584_v50 = vmul.f32 %v575_v37, %v351_v13  ;;  %v671_v51 = vmul.f32 %v662_v38, %v351_v13 }
 0x11b   : > { %v413_v45 = vadd.f32 %v412_v39, %v411_v30  ;;  %v503_v1 = vadd.f32 %v502_v40, %v501_v31  ;;  %v419_v47 = vrot.slane %v418_v41, 4  ;;  %v509_v48 = vrot.slane %v508_v42, 4 }
 0x11c   : > { %v579_v52 = vpop.f32.mrf.mxu0  ;;  %v666_v53 = vpop.f32.mrf.mxu1  ;;  %v585_v56 = vmul.f32 %v577_v43, %v352_v15  ;;  %v672_v57 = vmul.f32 %v664_v44, %v352_v15 }
 0x11d   : > { %v414_v28 = vrot.slane %v413_v45, 2  ;;  %v504_v54 = vrot.slane %v503_v1, 2  ;;  %v420_v5 = vadd.f32 %v419_v47, %v418_v41  ;;  %v510_v55 = vadd.f32 %v509_v48, %v508_v42 }
 0x11e   : > { %v586_v58 = vmul.f32 %v579_v52, %v353_v22  ;;  %v673_v26 = vmul.f32 %v666_v53, %v353_v22  ;;  %v581_v34 = vpop.f32.mrf.mxu0  ;;  %v668_v46 = vpop.f32.mrf.mxu1  ;;  %v433_v22 = vsub.s32 %v430_v49, %v1078_v14 }
 0x11f   : > { %v415_v61 = vadd.f32 %v414_v28, %v413_v45  ;;  %v505_v62 = vadd.f32 %v504_v54, %v503_v1  ;;  %v421_v63 = vrot.slane %v420_v5, 2  ;;  %v511_v2 = vrot.slane %v510_v55, 2 }
 0x120   : > { %v588_v3 = vadd.f32 %v586_v58, %v584_v50  ;;  %v675_v4 = vadd.f32 %v673_v26, %v671_v51  ;;  %v587_v6 = vmul.f32 %v581_v34, %v354_v18  ;;  %v674_v7 = vmul.f32 %v668_v46, %v354_v18 }
 0x121   : > { %v416_v8 = vrot.slane %v415_v61, 1  ;;  %v506_v9 = vrot.slane %v505_v62, 1  ;;  %v422_v10 = vadd.f32 %v421_v63, %v420_v5  ;;  %v512_v11 = vadd.f32 %v511_v2, %v510_v55 }
 0x122   : > { %v589_v12 = vrot.slane %v588_v3, 4  ;;  %v676_v13 = vrot.slane %v675_v4, 4  ;;  %v595_v15 = vadd.f32 %v587_v6, %v585_v56  ;;  %v682_v16 = vadd.f32 %v674_v7, %v672_v57 }
 0x123   : > { %v423_v17 = vrot.slane %v422_v10, 1  ;;  %v513_v19 = vrot.slane %v512_v11, 1  ;;  %v417_v18 = vadd.f32 %v416_v8, %v415_v61  ;;  %v507_v23 = vadd.f32 %v506_v9, %v505_v62 }
 0x124   : > { %v590_v59 = vadd.f32 %v589_v12, %v588_v3  ;;  %v677_v20 = vadd.f32 %v676_v13, %v675_v4  ;;  %v596_v60 = vrot.slane %v595_v15, 4  ;;  %v683_v21 = vrot.slane %v682_v16, 4 }
 0x125   : > { %v424_v24 = vadd.f32 %v423_v17, %v422_v10  ;;  %v514_v25 = vadd.f32 %v513_v19, %v512_v11 }
 0x126   : > { %v591_v27 = vrot.slane %v590_v59, 2  ;;  %v678_v29 = vrot.slane %v677_v20, 2  ;;  %v597_v30 = vadd.f32 %v596_v60, %v595_v15  ;;  %v684_v31 = vadd.f32 %v683_v21, %v682_v16 }
 0x127   : > { %v427_v32 = vcombine.low %v417_v18, %v424_v24  ;;  %v517_v33 = vcombine.low %v507_v23, %v514_v25 }
 0x128   : > { %v592_v14 = vadd.f32 %v591_v27, %v590_v59  ;;  %v679_v35 = vadd.f32 %v678_v29, %v677_v20  ;;  %v598_v36 = vrot.slane %v597_v30, 2  ;;  %v685_v37 = vrot.slane %v684_v31, 2 }
 0x129   : > { %v434_v38 = vrot.slane %v427_v32, %v433_v22  ;;  %v524_v39 = vrot.slane %v517_v33, %v433_v22 }
 0x12a   : > { %v593_v41 = vrot.slane %v592_v14, 1  ;;  %v680_v42 = vrot.slane %v679_v35, 1  ;;  %v599_v43 = vadd.f32 %v598_v36, %v597_v30  ;;  %v686_v44 = vadd.f32 %v685_v37, %v684_v31 }
 0x12b   : > { %v441_v45 = vrot.slane %v434_v38, %v433_v22  ;;  %v531_v1 = vrot.slane %v524_v39, %v433_v22 }
 0x12c   : > { %v600_v47 = vrot.slane %v599_v43, 1  ;;  %v687_v48 = vrot.slane %v686_v44, 1  ;;  %v594_v0 = vadd.f32 %v593_v41, %v592_v14  ;;  %v681_v49 = vadd.f32 %v680_v42, %v679_v35 }
 0x12d   : > { %447 = vst.msk [vmem:[%s176_s6] ss:$4 sm:$0x3] %vm1140_vm5, %v441_v45  ;;  %843 = vst.msk [vmem:[%s176_s6 + $0x1] ss:$4 sm:$0x3] %vm1140_vm5, %v531_v1 }
 0x12e   : > { %v601_v50 = vadd.f32 %v600_v47, %v599_v43  ;;  %v688_v51 = vadd.f32 %v687_v48, %v686_v44 }
 0x130   : > { %v604_v52 = vcombine.low %v594_v0, %v601_v50  ;;  %v691_v53 = vcombine.low %v681_v49, %v688_v51 }
 0x132   : > { %v611_v28 = vrot.slane %v604_v52, %v433_v22  ;;  %v698_v54 = vrot.slane %v691_v53, %v433_v22 }
 0x134   : > { %v618_v5 = vrot.slane %v611_v28, %v433_v22  ;;  %v705_v55 = vrot.slane %v698_v54, %v433_v22 }
 0x136   : > { %845 = vst.msk [vmem:[%s176_s6 + $0x2] ss:$4 sm:$0x3] %vm1140_vm5, %v618_v5  ;;  %847 = vst.msk [vmem:[%s176_s6 + $0x3] ss:$4 sm:$0x3] %vm1140_vm5, %v705_v55 }
 0x137   : > { %927 = shalt.err (!%p924_p5)
}
 0x138   : > { %s928_s26 = scalar_lea.hbm %s1152_s18, 128  ;;  %s932_s29 = scalar_lea.hbm %s1200_s2, 256 }
 0x139   : > { %p929_p6 = scmp.ne.s32.totalorder %s1152_s18, %s928_s26  ;;  %p933_p10 = scmp.lt.s32.totalorder %s1152_s18, %s1200_s2 }
 0x13a   : > { %p934_p11 = scmp.lt.s32.totalorder %s932_s29, %s928_s26 }
 0x13b   : > { %p930_p7 = pnand %p929_p6, %p1051_p4 }
 0x13c   : > { %p935_p12 = por %p934_p11, %p933_p10 }
 0x13d   : > { %p931_p9 = pneg %p930_p7 }
 0x13f   : > { %p936_p13 = pnand %p935_p12, %p931_p9 }
 0x141   : > { %939 = shalt.err (!%p936_p13)
}
 0x142   : > { %856 = dma.vmem_to_hbm [thread:$0]  (%p1051_p4), %s727_s8, 128, %s1152_s18, %s710_s20  }
 0x143 PF: > { %p862_p0 = scmp.ge.s32.totalorder %s990_s14, 2  ;;  %s738_s4 = sand.u32 1, %s970_s9  }
 0x144   : > { %s739_s5 = scalar_lea.sflag [#allocation3], %s738_s4 }
 0x145   : > { %p859_p1 = pnand %p862_p0, %p1058_p8 }
 0x147   : > { %p860_p2 = pneg %p859_p1 }
 0x149   : > { %965 = dma.done.wait (%p860_p2), %s739_s5, 128  }
 0x14a   : > { %967 = vsyncadd (%p860_p2), %s739_s5, 4294967168  ;;  %s15_s14 = sadd.s32 1, %s990_s14   ;;  %s1205_s9 = smov %s974_s10 }
 0x14b   : > { %p12_p3 = scmp.ge.s32.totalorder %s15_s14, 4   ;;  %s1206_s10 = smov %s978_s11 }
 0x14c   : > { %s1207_s11 = smov %s1064_s22  ;;  %s1208_s12 = smov %s986_s13 }
 0x14d   : > { %s1209_s13 = smov %s1211_s17  ;;  %14 = sbr.rel (!%p12_p3) target bundleno = 4 (0x4), region = 70 }
 0x152   :  { %744 = vsyncpa [#allocation3], 1 }
 0x153   :  { %746 = vsyncpa [#allocation3 + $0x1], 1 }

</bundles_post_ra>
